<compile_context>
chip_gen: v7x
topology: tpu7x:2x2x1
jax: 0.10.0
libtpu: 0.0.40
codegen_flags: <defaults>
</compile_context>

<pallas_src>
import numpy as np
import jax
import jax.numpy as jnp
from jax import lax
from jax.experimental import pallas as pl
from jax.experimental.pallas import tpu as pltpu


def _onehot_gather_kernel(ids_ref, wrep_ref, out_ref):
    # ids_ref  : VMEM [G, M, 1] int32   ids[g, r, 0] = token id of row r*G + g
    # wrep_ref : VMEM [G, V_pad, G*E]   table replicated; block g has W in
    #                                   output columns [g*E, (g+1)*E)
    # out_ref  : VMEM [M, G*E]          lane-dense packed output tile
    G, M, _ = ids_ref.shape
    v_pad = wrep_ref.shape[1]
    iota_v = lax.broadcasted_iota(jnp.int32, (M, v_pad), 1)
    acc = jnp.zeros(out_ref.shape, jnp.float32)
    for g in range(G):  # G is small & static (<= 8); fully unrolled
        onehot = (ids_ref[g] == iota_v).astype(wrep_ref.dtype)      # [M, V_pad]
        acc = acc + jnp.dot(onehot, wrep_ref[g],
                            preferred_element_type=jnp.float32)     # [M, G*E]
    out_ref[...] = acc.astype(out_ref.dtype)


def lookup_embeddings_pallas(token_ids, emb_table, *, rows_per_step=None,
                             max_rep_bytes=8 << 20):
    """Gather emb_table[token_ids] on-TPU with a one-hot-matmul Pallas kernel."""
    token_ids = jnp.asarray(token_ids, jnp.int32)
    N = int(token_ids.shape[0])
    V, E = int(emb_table.shape[0]), int(emb_table.shape[1])
    dtype = emb_table.dtype
    if N == 0:  # empty batch: avoid a zero-sized grid
        return jnp.zeros((0, E), dtype)

    itemsize = int(np.dtype(dtype).itemsize)
    V_pad = ((V + 7) // 8) * 8

    # Group G consecutive tokens per output row so the output last dim is >=128
    # lanes (lane-dense stores).  Keep the replicated table within a VMEM budget.
    G = max(1, min(128 // E, 8)) if E < 128 else 1
    while G > 1 and G * G * V_pad * E * itemsize > max_rep_bytes:
        G //= 2

    if rows_per_step is None:
        rows_per_step = max(128, 512 // G)   # ~512 tokens per grid step
    M = int(rows_per_step)

    # --- host-side packing (cheap XLA ops on small int arrays) ---------------
    n_rows = -(-N // G)
    n_rows_pad = -(-n_rows // M) * M
    n_tok_pad = n_rows_pad * G
    # padded tail tokens gather row 0 of the table; they are sliced off below.
    ids_pad = jnp.zeros((n_tok_pad,), jnp.int32).at[:N].set(token_ids)
    ids3 = ids_pad.reshape(n_rows_pad, G).T[:, :, None]        # [G, n_rows_pad, 1]

    w_p = jnp.zeros((V_pad, E), dtype).at[:V, :].set(emb_table)
    w_rep = jnp.stack(
        [jnp.zeros((V_pad, G * E), dtype).at[:, g * E:(g + 1) * E].set(w_p)
         for g in range(G)], axis=0)                           # [G, V_pad, G*E]

    # --- VMEM budget (table stays resident: constant index_map) --------------
    rep_bytes = G * V_pad * G * E * itemsize
    out_tile_bytes = M * G * E * itemsize
    ids_tile_bytes = G * M * 4
    vmem_limit = int(min(
        max(2 * (rep_bytes + out_tile_bytes + ids_tile_bytes) + (4 << 20),
            16 << 20),
        64 << 20))

    out = pl.pallas_call(
        _onehot_gather_kernel,
        out_shape=jax.ShapeDtypeStruct((n_rows_pad, G * E), dtype),
        grid_spec=pltpu.PrefetchScalarGridSpec(
            num_scalar_prefetch=0,
            grid=(n_rows_pad // M,),
            in_specs=[
                pl.BlockSpec((G, M, 1), lambda i: (0, i, 0)),
                # full replicated table, constant index_map -> stays resident
                pl.BlockSpec((G, V_pad, G * E), lambda i: (0, 0, 0)),
            ],
            out_specs=pl.BlockSpec((M, G * E), lambda i: (i, 0)),
        ),
        compiler_params=pltpu.CompilerParams(
            dimension_semantics=("parallel",),   # independent token tiles
            vmem_limit_bytes=vmem_limit),
    )(ids3, w_rep)

    # free contiguous reshape back to one embedding row per token
    return out.reshape(n_rows_pad * G, E)[:N]


def compute_boundaries(token_lists):
    # identical semantics to LookupEmbeddings._compute_boundaries
    return [np.cumsum([0] + [len(tl) for tl in item]) for item in token_lists]


def lookup_embeddings_forward(token_lists, vocab, emb_table):
    """Equivalent of LookupEmbeddings.forward: returns (packed_embs, boundaries).

    packed_embs is the [N_total, emb_size] matrix of embedded tokens, flattened
    per item and concatenated across the batch.
    """
    flat_tokens = [tok for item in token_lists for tl in item for tok in tl]
    token_ids = np.array([vocab[t] for t in flat_tokens], dtype=np.int32)
    embs = lookup_embeddings_pallas(jnp.asarray(token_ids), emb_table)
    return embs, compute_boundaries(token_lists)


if __name__ == "__main__":
    # ---- deterministic synthetic setup -------------------------------------
    emb_size = 32
    tokens = ["what", "is", "the", "name", "of", "table", "column",
              "select", "from", "where", "id", "a", "b", "c", "x", "y"]
    vocab = {t: i for i, t in enumerate(tokens)}
    vocab_size = 32  # a bit larger than len(tokens)

    key = jax.random.PRNGKey(0)
    emb_table = jax.random.normal(key, (vocab_size, emb_size), dtype=jnp.float32)

    token_lists = [
        [["what", "is", "the", "name"], ["of", "table"], ["column", "id"]],
        [["select", "a", "from", "b"], ["where", "x", "y"], ["c"]],
    ]

    # ---- run the Pallas forward --------------------------------------------
    embs, boundaries = lookup_embeddings_forward(token_lists, vocab, emb_table)
    embs = jax.block_until_ready(embs)

    # ---- correctness check against plain gather -----------------------------
    flat_ids = np.array(
        [vocab[t] for item in token_lists for tl in item for t in tl],
        dtype=np.int32)
    expected = np.asarray(emb_table)[flat_ids]
    np.testing.assert_allclose(np.asarray(embs), expected, rtol=1e-6, atol=1e-6)

    expected_bounds = [np.array([0, 4, 6, 8]), np.array([0, 4, 7, 8])]
    for got, exp in zip(boundaries, expected_bounds):
        assert np.array_equal(got, exp), (got, exp)

    # ---- second check: larger id stream exercising a multi-step grid --------
    big_ids = jax.random.randint(jax.random.PRNGKey(1), (1000,), 0, vocab_size,
                                 dtype=jnp.int32)
    big_out = lookup_embeddings_pallas(big_ids, emb_table, rows_per_step=64)
    big_out = jax.block_until_ready(big_out)
    np.testing.assert_allclose(np.asarray(big_out),
                               np.asarray(emb_table)[np.asarray(big_ids)],
                               rtol=1e-6, atol=1e-6)

    print("KERNEL_OK")
</pallas_src>

<mosaic_0001>
module attributes {stable_mosaic.version = 11 : i64} {
  func.func @_onehot_gather_kernel(%arg0: i32, %arg1: memref<4x128x1xi32, #tpu.memory_space<vmem>>, %arg2: memref<4x32x128xf32, #tpu.memory_space<vmem>>, %arg3: memref<128x128xf32, #tpu.memory_space<vmem>>) attributes {dimension_semantics = [#tpu.dimension_semantics<parallel>], iteration_bounds = array<i64: 1>, scalar_prefetch = 0 : i64, scratch_operands = 0 : i64, tpu.core_type = #tpu.core_type<tc>, window_params = [{transform_indices = @transform_0, window_bounds = array<i64: 4, 128, 1>}, {pipeline_mode = #tpu.pipeline_mode<synchronous>, transform_indices = @transform_1, window_bounds = array<i64: 4, 32, 128>}, {transform_indices = @transform_2, window_bounds = array<i64: 128, 128>}]} {
    %0 = tpu.iota {dimensions = array<i32: 1>} : vector<128x32xi32>
    %cst = arith.constant 0.000000e+00 : f32
    %1 = vector.broadcast %cst : f32 to vector<128x128xf32>
    %c0 = arith.constant 0 : index
    %c0_0 = arith.constant 0 : index
    %c0_1 = arith.constant 0 : index
    %2 = vector.load %arg1[%c0, %c0_0, %c0_1] : memref<4x128x1xi32, #tpu.memory_space<vmem>>, vector<1x128x1xi32>
    %3 = vector.shape_cast %2 : vector<1x128x1xi32> to vector<128x1xi32>
    %4 = vector.broadcast %3 : vector<128x1xi32> to vector<128x32xi32>
    %5 = arith.cmpi eq, %4, %0 : vector<128x32xi32>
    %6 = arith.extui %5 : vector<128x32xi1> to vector<128x32xi32>
    %7 = arith.sitofp %6 : vector<128x32xi32> to vector<128x32xf32>
    %c0_2 = arith.constant 0 : index
    %c0_3 = arith.constant 0 : index
    %c0_4 = arith.constant 0 : index
    %8 = vector.load %arg2[%c0_2, %c0_3, %c0_4] : memref<4x32x128xf32, #tpu.memory_space<vmem>>, vector<1x32x128xf32>
    %9 = vector.shape_cast %8 : vector<1x32x128xf32> to vector<32x128xf32>
    %cst_5 = arith.constant dense<0.000000e+00> : vector<128x128xf32>
    %10 = tpu.matmul %7, %9, %cst_5 {dimension_numbers = #tpu.dot_dimension_numbers<[1], [0], [0], [1], [0, 0, 1, 1], [], []>} : vector<128x32xf32>, vector<32x128xf32>, vector<128x128xf32> -> vector<128x128xf32>
    %11 = arith.addf %1, %10 : vector<128x128xf32>
    %c1 = arith.constant 1 : index
    %c0_6 = arith.constant 0 : index
    %c0_7 = arith.constant 0 : index
    %12 = vector.load %arg1[%c1, %c0_6, %c0_7] : memref<4x128x1xi32, #tpu.memory_space<vmem>>, vector<1x128x1xi32>
    %13 = vector.shape_cast %12 : vector<1x128x1xi32> to vector<128x1xi32>
    %14 = vector.broadcast %13 : vector<128x1xi32> to vector<128x32xi32>
    %15 = arith.cmpi eq, %14, %0 : vector<128x32xi32>
    %16 = arith.extui %15 : vector<128x32xi1> to vector<128x32xi32>
    %17 = arith.sitofp %16 : vector<128x32xi32> to vector<128x32xf32>
    %c1_8 = arith.constant 1 : index
    %c0_9 = arith.constant 0 : index
    %c0_10 = arith.constant 0 : index
    %18 = vector.load %arg2[%c1_8, %c0_9, %c0_10] : memref<4x32x128xf32, #tpu.memory_space<vmem>>, vector<1x32x128xf32>
    %19 = vector.shape_cast %18 : vector<1x32x128xf32> to vector<32x128xf32>
    %cst_11 = arith.constant dense<0.000000e+00> : vector<128x128xf32>
    %20 = tpu.matmul %17, %19, %cst_11 {dimension_numbers = #tpu.dot_dimension_numbers<[1], [0], [0], [1], [0, 0, 1, 1], [], []>} : vector<128x32xf32>, vector<32x128xf32>, vector<128x128xf32> -> vector<128x128xf32>
    %21 = arith.addf %11, %20 : vector<128x128xf32>
    %c2 = arith.constant 2 : index
    %c0_12 = arith.constant 0 : index
    %c0_13 = arith.constant 0 : index
    %22 = vector.load %arg1[%c2, %c0_12, %c0_13] : memref<4x128x1xi32, #tpu.memory_space<vmem>>, vector<1x128x1xi32>
    %23 = vector.shape_cast %22 : vector<1x128x1xi32> to vector<128x1xi32>
    %24 = vector.broadcast %23 : vector<128x1xi32> to vector<128x32xi32>
    %25 = arith.cmpi eq, %24, %0 : vector<128x32xi32>
    %26 = arith.extui %25 : vector<128x32xi1> to vector<128x32xi32>
    %27 = arith.sitofp %26 : vector<128x32xi32> to vector<128x32xf32>
    %c2_14 = arith.constant 2 : index
    %c0_15 = arith.constant 0 : index
    %c0_16 = arith.constant 0 : index
    %28 = vector.load %arg2[%c2_14, %c0_15, %c0_16] : memref<4x32x128xf32, #tpu.memory_space<vmem>>, vector<1x32x128xf32>
    %29 = vector.shape_cast %28 : vector<1x32x128xf32> to vector<32x128xf32>
    %cst_17 = arith.constant dense<0.000000e+00> : vector<128x128xf32>
    %30 = tpu.matmul %27, %29, %cst_17 {dimension_numbers = #tpu.dot_dimension_numbers<[1], [0], [0], [1], [0, 0, 1, 1], [], []>} : vector<128x32xf32>, vector<32x128xf32>, vector<128x128xf32> -> vector<128x128xf32>
    %31 = arith.addf %21, %30 : vector<128x128xf32>
    %c3 = arith.constant 3 : index
    %c0_18 = arith.constant 0 : index
    %c0_19 = arith.constant 0 : index
    %32 = vector.load %arg1[%c3, %c0_18, %c0_19] : memref<4x128x1xi32, #tpu.memory_space<vmem>>, vector<1x128x1xi32>
    %33 = vector.shape_cast %32 : vector<1x128x1xi32> to vector<128x1xi32>
    %34 = vector.broadcast %33 : vector<128x1xi32> to vector<128x32xi32>
    %35 = arith.cmpi eq, %34, %0 : vector<128x32xi32>
    %36 = arith.extui %35 : vector<128x32xi1> to vector<128x32xi32>
    %37 = arith.sitofp %36 : vector<128x32xi32> to vector<128x32xf32>
    %c3_20 = arith.constant 3 : index
    %c0_21 = arith.constant 0 : index
    %c0_22 = arith.constant 0 : index
    %38 = vector.load %arg2[%c3_20, %c0_21, %c0_22] : memref<4x32x128xf32, #tpu.memory_space<vmem>>, vector<1x32x128xf32>
    %39 = vector.shape_cast %38 : vector<1x32x128xf32> to vector<32x128xf32>
    %cst_23 = arith.constant dense<0.000000e+00> : vector<128x128xf32>
    %40 = tpu.matmul %37, %39, %cst_23 {dimension_numbers = #tpu.dot_dimension_numbers<[1], [0], [0], [1], [0, 0, 1, 1], [], []>} : vector<128x32xf32>, vector<32x128xf32>, vector<128x128xf32> -> vector<128x128xf32>
    %41 = arith.addf %31, %40 : vector<128x128xf32>
    %c0_24 = arith.constant 0 : index
    %c0_25 = arith.constant 0 : index
    %42 = vector.load %arg3[%c0_24, %c0_25] : memref<128x128xf32, #tpu.memory_space<vmem>>, vector<128x128xf32>
    tpu.vector_store %arg3[%c0_24, %c0_25], %41 {strides = array<i32>} : memref<128x128xf32, #tpu.memory_space<vmem>>, vector<128x128xf32>,
    return
  }
  func.func @transform_0(%arg0: i32) -> (i32, i32, i32) {
    %c0_i32 = arith.constant 0 : i32
    %c0_i32_0 = arith.constant 0 : i32
    %c0_i32_1 = arith.constant 0 : i32
    return %c0_i32, %arg0, %c0_i32_0 : i32, i32, i32
  }
  func.func @transform_1(%arg0: i32) -> (i32, i32, i32) {
    %c0_i32 = arith.constant 0 : i32
    %c0_i32_0 = arith.constant 0 : i32
    %c0_i32_1 = arith.constant 0 : i32
    %c0_i32_2 = arith.constant 0 : i32
    return %c0_i32, %c0_i32_0, %c0_i32_1 : i32, i32, i32
  }
  func.func @transform_2(%arg0: i32) -> (i32, i32) {
    %c0_i32 = arith.constant 0 : i32
    %c0_i32_0 = arith.constant 0 : i32
    return %arg0, %c0_i32 : i32, i32
  }
}

</mosaic_0001>

<bundles_post_ra>
// kernel: tpu_custom_call.1
= control target key start
LH: loop header
LB: loop body
LE: loop exit
PB: predicated region body
PF: predicated region fallthrough
CT: control target
= control target key end

     0   :  { %v1828_v2 = vmov 0   ;;  %s2302_s0 = inlined_call_operand.vmem [shape: s32[4,128,1], index: 0, kind: input, shape index: {}]   ;;  %s2303_s1 = inlined_call_operand.vmem [shape: f32[4,32,128], index: 1, kind: input, shape index: {}]   ;;  %s2304_s2 = inlined_call_operand.hbm [shape: f32[128,128], index: 2, kind: output, shape index: {}]  }
   0x1   :  { %v1338_v0 = vld [vmem:[%s2302_s0 + $0x88] sm:$0xff]  ;;  %v1337_v1 = vld [vmem:[%s2302_s0 + $0x80] sm:$0xff]  ;;  %1803 = vset.pattern.permute.xlu1 %v1828_v2  ;;  %1802 = vset.pattern.permute.xlu0 %v1828_v2  ;;  %v1407_v5 = vld [vmem:[%s2302_s0 + $0x110] sm:$0xff] }
   0x2   :  { %151 = vperm.xlu1 %1803, %v1338_v0   ;;  %148 = vperm.xlu0 %1802, %v1337_v1   ;;  %v1406_v3 = vld [vmem:[%s2302_s0 + $0x108] sm:$0xff]  ;;  %v1405_v4 = vld [vmem:[%s2302_s0 + $0x100] sm:$0xff]  ;;  %v1339_v6 = vld [vmem:[%s2302_s0 + $0x90] sm:$0xff] }
   0x3   :  { %v1408_v7 = vld [vmem:[%s2302_s0 + $0x118] sm:$0xff]  ;;  %v1409_v9 = vld [vmem:[%s2302_s0 + $0x120] sm:$0xff]  ;;  %v1410_v11 = vld [vmem:[%s2302_s0 + $0x128] sm:$0xff] }
   0x4   :  { %v1340_v8 = vld [vmem:[%s2302_s0 + $0x98] sm:$0xff]  ;;  %v1341_v10 = vld [vmem:[%s2302_s0 + $0xa0] sm:$0xff]  ;;  %v1342_v12 = vld [vmem:[%s2302_s0 + $0xa8] sm:$0xff] }
   0x5   :  { %v1369_v13 = vld [vmem:[%s2303_s1 + $0x20] sm:$0xff]  ;;  %v1411_v14 = vld [vmem:[%s2302_s0 + $0x130] sm:$0xff]  ;;  %v1370_v16 = vld [vmem:[%s2303_s1 + $0x28] sm:$0xff] }
   0x6   :  { %656 = vperm.xlu1 %1803, %v1406_v3   ;;  %653 = vperm.xlu0 %1802, %v1405_v4   ;;  %v1343_v15 = vld [vmem:[%s2302_s0 + $0xb0] sm:$0xff]  ;;  %v1717_v17 = vpack.c.bf16 %v1370_v16, %v1369_v13  ;;  %v1372_v19 = vld [vmem:[%s2303_s1 + $0x38] sm:$0xff]  ;;  %v1437_v20 = vld [vmem:[%s2303_s1 + $0x40] sm:$0xff] }
   0x7   :  { %v1371_v18 = vld [vmem:[%s2303_s1 + $0x30] sm:$0xff]  ;;  %v1438_v22 = vld [vmem:[%s2303_s1 + $0x48] sm:$0xff]  ;;  %v1440_v24 = vld [vmem:[%s2303_s1 + $0x58] sm:$0xff] }
   0x8   :  { %v1721_v21 = vpack.c.bf16 %v1372_v19, %v1371_v18  ;;  %v1439_v23 = vld [vmem:[%s2303_s1 + $0x50] sm:$0xff]  ;;  %1718 = vmatprep.subr.bf16.mxu1 %v1717_v17  ;;  %v1733_v25 = vpack.c.bf16 %v1438_v22, %v1437_v20 }
   0xa   :  { %659 = vperm.xlu1 %1803, %v1407_v5   ;;  %154 = vperm.xlu0 %1802, %v1339_v6  }
   0xe   :  { %662 = vperm.xlu1 %1803, %v1408_v7   ;;  %157 = vperm.xlu0 %1802, %v1340_v8  }
  0x12   :  { %665 = vperm.xlu1 %1803, %v1409_v9   ;;  %160 = vperm.xlu0 %1802, %v1341_v10  }
  0x16   :  { %668 = vperm.xlu1 %1803, %v1410_v11   ;;  %163 = vperm.xlu0 %1802, %v1342_v12  }
  0x17   :  { %7 = vsyncpa [#allocation3], 0  ;;  %1720 = vmatpush3.bf16.msra.mxu1 %v1717_v17  ;;  %v1737_v26 = vpack.c.bf16 %v1440_v24, %v1439_v23  ;;  %v1412_v27 = vld [vmem:[%s2302_s0 + $0x138] sm:$0xff]  ;;  %1734 = vmatprep.subr.bf16.mxu0 %v1733_v25  ;;  %v1413_v29 = vld [vmem:[%s2302_s0 + $0x140] sm:$0xff]  ;;  %v12_v17 = vlaneseq  ;;  %vm248_vm0 = vcmask 261120  }
  0x18   :  { %v1344_v28 = vld [vmem:[%s2302_s0 + $0xb8] sm:$0xff]  ;;  %1722 = vmatprep.subr.bf16.mxu1 %v1721_v21  ;;  %1736 = vmatpush3.bf16.msra.mxu0 %v1733_v25  ;;  %v1345_v30 = vld [vmem:[%s2302_s0 + $0xc0] sm:$0xff]  ;;  %v1414_v31 = vld [vmem:[%s2302_s0 + $0x148] sm:$0xff]  ;;  %v1829_v25 = vmov 0.0  }
  0x19   :  { %1738 = vmatprep.subr.bf16.mxu0 %v1737_v26  ;;  %v1346_v32 = vld [vmem:[%s2302_s0 + $0xc8] sm:$0xff]  ;;  %v1415_v33 = vld [vmem:[%s2302_s0 + $0x150] sm:$0xff]  ;;  %v1416_v35 = vld [vmem:[%s2302_s0 + $0x158] sm:$0xff]  ;;  %v2082_v20 = vand.u32 127, %v12_v17 }
  0x1a   :  { %671 = vperm.xlu1 %1803, %v1411_v14   ;;  %166 = vperm.xlu0 %1802, %v1343_v15   ;;  %v1347_v34 = vld [vmem:[%s2302_s0 + $0xd0] sm:$0xff]  ;;  %v1348_v36 = vld [vmem:[%s2302_s0 + $0xd8] sm:$0xff]  ;;  %v1417_v37 = vld [vmem:[%s2302_s0 + $0x160] sm:$0xff] }
  0x1b   :  { %1724 = vmatpush3.bf16.msra.mxu1 %v1721_v21  ;;  %v1349_v38 = vld [vmem:[%s2302_s0 + $0xe0] sm:$0xff]  ;;  %v1418_v39 = vld [vmem:[%s2302_s0 + $0x168] sm:$0xff]  ;;  %v1419_v41 = vld [vmem:[%s2302_s0 + $0x170] sm:$0xff] }
  0x1c   :  { %1740 = vmatpush3.bf16.msra.mxu0 %v1737_v26  ;;  %v1350_v40 = vld [vmem:[%s2302_s0 + $0xe8] sm:$0xff]  ;;  %v1351_v42 = vld [vmem:[%s2302_s0 + $0xf0] sm:$0xff]  ;;  %v1420_v43 = vld [vmem:[%s2302_s0 + $0x178] sm:$0xff] }
  0x1d   :  { %v1352_v44 = vld [vmem:[%s2302_s0 + $0xf8] sm:$0xff]  ;;  %v126_v45 = vld [vmem:[%s2303_s1] sm:$0xff]  ;;  %v127_v46 = vld [vmem:[%s2303_s1 + $0x8] sm:$0xff] }
  0x1e   :  { %674 = vperm.xlu1 %1803, %v1412_v27   ;;  %169 = vperm.xlu0 %1802, %v1344_v28   ;;  %v1489_v47 = vld [vmem:[%s2303_s1 + $0x60] sm:$0xff]  ;;  %v1977_v48 = vpack.c.bf16 %v127_v46, %v126_v45  ;;  %v1490_v49 = vld [vmem:[%s2303_s1 + $0x68] sm:$0xff]  ;;  %v1459_v55 = vld [vmem:[%s2302_s0 + $0x190] sm:$0xff] }
  0x1f   :  { %v1457_v50 = vld [vmem:[%s2302_s0 + $0x180] sm:$0xff]  ;;  %v1988_v52 = vpack.c.bf16 %v1490_v49, %v1489_v47  ;;  %v1458_v53 = vld [vmem:[%s2302_s0 + $0x188] sm:$0xff]  ;;  %v16_v56 = vld [vmem:[%s2302_s0 + $0x10] sm:$0xff] }
  0x20   :  { %v14_v51 = vld [vmem:[%s2302_s0] sm:$0xff]  ;;  %1726 = vmatprep.subr.bf16.mxu1 %v1977_v48  ;;  %v15_v54 = vld [vmem:[%s2302_s0 + $0x8] sm:$0xff]  ;;  %v1460_v57 = vld [vmem:[%s2302_s0 + $0x198] sm:$0xff] }
  0x21   :  { %1742 = vmatprep.subr.bf16.mxu0 %v1988_v52  ;;  %v17_v58 = vld [vmem:[%s2302_s0 + $0x18] sm:$0xff]  ;;  %v1461_v59 = vld [vmem:[%s2302_s0 + $0x1a0] sm:$0xff]  ;;  %v1462_v61 = vld [vmem:[%s2302_s0 + $0x1a8] sm:$0xff] }
  0x22   :  { %677 = vperm.xlu1 %1803, %v1413_v29   ;;  %172 = vperm.xlu0 %1802, %v1345_v30   ;;  %v18_v60 = vld [vmem:[%s2302_s0 + $0x20] sm:$0xff]  ;;  %v19_v62 = vld [vmem:[%s2302_s0 + $0x28] sm:$0xff]  ;;  %v1463_v63 = vld [vmem:[%s2302_s0 + $0x1b0] sm:$0xff] }
  0x23   :  { %v20_v0 = vld [vmem:[%s2302_s0 + $0x30] sm:$0xff]  ;;  %v1464_v1 = vld [vmem:[%s2302_s0 + $0x1b8] sm:$0xff]  ;;  %v1465_v3 = vld [vmem:[%s2302_s0 + $0x1c0] sm:$0xff] }
  0x24   :  { %v21_v2 = vld [vmem:[%s2302_s0 + $0x38] sm:$0xff]  ;;  %v22_v4 = vld [vmem:[%s2302_s0 + $0x40] sm:$0xff]  ;;  %v1466_v5 = vld [vmem:[%s2302_s0 + $0x1c8] sm:$0xff] }
  0x25   :  { %v23_v6 = vld [vmem:[%s2302_s0 + $0x48] sm:$0xff]  ;;  %v1467_v7 = vld [vmem:[%s2302_s0 + $0x1d0] sm:$0xff]  ;;  %v1468_v9 = vld [vmem:[%s2302_s0 + $0x1d8] sm:$0xff] }
  0x26   :  { %680 = vperm.xlu1 %1803, %v1414_v31   ;;  %175 = vperm.xlu0 %1802, %v1346_v32   ;;  %v24_v8 = vld [vmem:[%s2302_s0 + $0x50] sm:$0xff]  ;;  %v25_v10 = vld [vmem:[%s2302_s0 + $0x58] sm:$0xff]  ;;  %v1469_v11 = vld [vmem:[%s2302_s0 + $0x1e0] sm:$0xff] }
  0x27   :  { %v26_v12 = vld [vmem:[%s2302_s0 + $0x60] sm:$0xff]  ;;  %v1470_v13 = vld [vmem:[%s2302_s0 + $0x1e8] sm:$0xff]  ;;  %v1471_v15 = vld [vmem:[%s2302_s0 + $0x1f0] sm:$0xff] }
  0x28   :  { %v27_v14 = vld [vmem:[%s2302_s0 + $0x68] sm:$0xff]  ;;  %v28_v16 = vld [vmem:[%s2302_s0 + $0x70] sm:$0xff]  ;;  %v1472_v18 = vld [vmem:[%s2302_s0 + $0x1f8] sm:$0xff] }
  0x29   :  { %v29_v19 = vld [vmem:[%s2302_s0 + $0x78] sm:$0xff]  ;;  %v128_v21 = vld [vmem:[%s2303_s1 + $0x10] sm:$0xff] }
  0x2a   :  { %683 = vperm.xlu1 %1803, %v1415_v33   ;;  %178 = vperm.xlu0 %1802, %v1347_v34   ;;  %v129_v22 = vld [vmem:[%s2303_s1 + $0x18] sm:$0xff]  ;;  %v1491_v29 = vld [vmem:[%s2303_s1 + $0x70] sm:$0xff] }
  0x2b   :  { %v1729_v28 = vpack.c.bf16 %v129_v22, %v128_v21  ;;  %v1492_v30 = vld [vmem:[%s2303_s1 + $0x78] sm:$0xff]  ;;  %s1830_s1 = smov [#allocation2]  }
  0x2c   :  { %s1310_s28 = sshll.u32 %s1830_s1, 4  ;;  %s1311_s28 = int_to_ptr.vmem [resolvable:$true] %s1310_s28 }
  0x2d   :  { %s1804_s29 = scalar_lea.vmem %s1311_s28, 2048  ;;  %p1809_p1 = scmp.lt.s32.totalorder %s1311_s28, %s1311_s28 }
  0x2e   :  { %686 = vperm.xlu1 %1803, %v1416_v35   ;;  %181 = vperm.xlu0 %1802, %v1348_v36   ;;  %v1745_v35 = vpack.c.bf16 %v1492_v30, %v1491_v29  ;;  %p1805_p0 = scmp.ne.s32.totalorder %s1311_s28, %s1804_s29  ;;  %p1810_p2 = scmp.lt.s32.totalorder %s1804_s29, %s1804_s29 }
  0x30   :  { %p1811_p3 = por %p1810_p2, %p1809_p1 }
  0x32   :  { %689 = vperm.xlu1 %1803, %v1417_v37   ;;  %184 = vperm.xlu0 %1802, %v1349_v38   ;;  %p1812_p4 = pnand %p1811_p3, %p1805_p0 }
  0x36   :  { %692 = vperm.xlu1 %1803, %v1418_v39   ;;  %187 = vperm.xlu0 %1802, %v1350_v40  }
  0x3a   :  { %695 = vperm.xlu1 %1803, %v1419_v41   ;;  %190 = vperm.xlu0 %1802, %v1351_v42  }
  0x3e   :  { %698 = vperm.xlu1 %1803, %v1420_v43   ;;  %193 = vperm.xlu0 %1802, %v1352_v44  }
  0x42   :  { %980 = vperm.xlu1 %1803, %v1457_v50   ;;  %31 = vperm.xlu0 %1802, %v14_v51  }
  0x46   :  { %983 = vperm.xlu1 %1803, %v1458_v53   ;;  %34 = vperm.xlu0 %1802, %v15_v54  }
  0x4a   :  { %986 = vperm.xlu1 %1803, %v1459_v55   ;;  %37 = vperm.xlu0 %1802, %v16_v56  }
  0x4e   :  { %989 = vperm.xlu1 %1803, %v1460_v57   ;;  %40 = vperm.xlu0 %1802, %v17_v58  }
  0x52   :  { %992 = vperm.xlu1 %1803, %v1461_v59   ;;  %43 = vperm.xlu0 %1802, %v18_v60  }
  0x56   :  { %995 = vperm.xlu1 %1803, %v1462_v61   ;;  %46 = vperm.xlu0 %1802, %v19_v62  }
  0x5a   :  { %998 = vperm.xlu1 %1803, %v1463_v63   ;;  %49 = vperm.xlu0 %1802, %v20_v0  }
  0x5e   :  { %1001 = vperm.xlu1 %1803, %v1464_v1   ;;  %52 = vperm.xlu0 %1802, %v21_v2  }
  0x62   :  { %1004 = vperm.xlu1 %1803, %v1465_v3   ;;  %55 = vperm.xlu0 %1802, %v22_v4  }
  0x66   :  { %1007 = vperm.xlu1 %1803, %v1466_v5   ;;  %58 = vperm.xlu0 %1802, %v23_v6  }
  0x6a   :  { %1010 = vperm.xlu1 %1803, %v1467_v7   ;;  %61 = vperm.xlu0 %1802, %v24_v8  }
  0x6e   :  { %1013 = vperm.xlu1 %1803, %v1468_v9   ;;  %64 = vperm.xlu0 %1802, %v25_v10  }
  0x72   :  { %1016 = vperm.xlu1 %1803, %v1469_v11   ;;  %67 = vperm.xlu0 %1802, %v26_v12  }
  0x76   :  { %1019 = vperm.xlu1 %1803, %v1470_v13   ;;  %70 = vperm.xlu0 %1802, %v27_v14  }
  0x7a   :  { %1022 = vperm.xlu1 %1803, %v1471_v15   ;;  %73 = vperm.xlu0 %1802, %v28_v16  }
  0x7e   :  { %1025 = vperm.xlu1 %1803, %v1472_v18   ;;  %76 = vperm.xlu0 %1802, %v29_v19  }
  0x81   :  { %v152_v23 = vpop.permute.xlu1 %151  ;;  %v149_v24 = vpop.permute.xlu0 %148 }
  0x82   :  { %vm196_vm1 = vcmp.eq.s32.totalorder %v152_v23, %v2082_v20  ;;  %vm195_vm2 = vcmp.eq.s32.totalorder %v149_v24, %v2082_v20 }
  0x83   :  { %v1354_v26 = vsel %vm196_vm1, 1.0, %v1829_v25  ;;  %v1353_v27 = vsel %vm195_vm2, 1.0, %v1829_v25 }
  0x84   :  { %1597 = vmatprep.mubr.msk.f32.mxu1 %vm248_vm0, %v1353_v27 }
  0x85   :  { %v657_v31 = vpop.permute.xlu1 %656  ;;  %v654_v32 = vpop.permute.xlu0 %653  ;;  %1598 = vmatmul.mubr.msk.f32.vlgmr.msra.gmra.mrb[0].mxu1 %vm248_vm0, %v1354_v26 }
  0x86   :  { %vm701_vm3 = vcmp.eq.s32.totalorder %v657_v31, %v2082_v20  ;;  %vm700_vm4 = vcmp.eq.s32.totalorder %v654_v32, %v2082_v20  ;;  %1728 = vmatpush3.bf16.msra.mxu1 %v1977_v48 }
  0x87   :  { %v1422_v33 = vsel %vm701_vm3, 1.0, %v1829_v25  ;;  %v1421_v34 = vsel %vm700_vm4, 1.0, %v1829_v25  ;;  %1730 = vmatprep.subr.bf16.mxu1 %v1729_v28 }
  0x88   :  { %1661 = vmatprep.mubr.msk.f32.mxu0 %vm248_vm0, %v1421_v34 }
  0x89   :  { %v660_v36 = vpop.permute.xlu1 %659  ;;  %v155_v37 = vpop.permute.xlu0 %154  ;;  %1662 = vmatmul.mubr.msk.f32.vlgmr.msra.gmra.mrb[0].mxu0 %vm248_vm0, %v1422_v33 }
  0x8a   :  { %vm702_vm5 = vcmp.eq.s32.totalorder %v660_v36, %v2082_v20  ;;  %vm197_vm6 = vcmp.eq.s32.totalorder %v155_v37, %v2082_v20  ;;  %1744 = vmatpush3.bf16.msra.mxu0 %v1988_v52  ;;  %1732 = vmatpush3.bf16.msra.mxu1 %v1729_v28 }
  0x8b   :  { %v1423_v38 = vsel %vm702_vm5, 1.0, %v1829_v25  ;;  %v1355_v39 = vsel %vm197_vm6, 1.0, %v1829_v25  ;;  %1746 = vmatprep.subr.bf16.mxu0 %v1745_v35 }
  0x8c   :  { %1600 = vmatprep.mubr.msk.f32.mxu1 %vm248_vm0, %v1355_v39  ;;  %1664 = vmatprep.mubr.msk.f32.mxu0 %vm248_vm0, %v1423_v38 }
  0x8d   :  { %v663_v40 = vpop.permute.xlu1 %662  ;;  %v158_v41 = vpop.permute.xlu0 %157 }
  0x8e   :  { %vm703_vm7 = vcmp.eq.s32.totalorder %v663_v40, %v2082_v20  ;;  %vm198_vm8 = vcmp.eq.s32.totalorder %v158_v41, %v2082_v20  ;;  %1748 = vmatpush3.bf16.msra.mxu0 %v1745_v35 }
  0x8f   :  { %v1424_v42 = vsel %vm703_vm7, 1.0, %v1829_v25  ;;  %v1356_v43 = vsel %vm198_vm8, 1.0, %v1829_v25 }
  0x90   :  { %1601 = vmatmul.mubr.msk.f32.gmra.mrb[2].mxu1 %vm248_vm0, %v1356_v43  ;;  %1665 = vmatmul.mubr.msk.f32.gmra.mrb[2].mxu0 %vm248_vm0, %v1424_v42 }
  0x91   :  { %v666_v44 = vpop.permute.xlu1 %665  ;;  %v161_v45 = vpop.permute.xlu0 %160 }
  0x92   :  { %vm704_vm9 = vcmp.eq.s32.totalorder %v666_v44, %v2082_v20  ;;  %vm199_vm10 = vcmp.eq.s32.totalorder %v161_v45, %v2082_v20 }
  0x93   :  { %v1425_v46 = vsel %vm704_vm9, 1.0, %v1829_v25  ;;  %v1357_v47 = vsel %vm199_vm10, 1.0, %v1829_v25 }
  0x94   :  { %1603 = vmatprep.mubr.msk.f32.mxu1 %vm248_vm0, %v1357_v47  ;;  %1667 = vmatprep.mubr.msk.f32.mxu0 %vm248_vm0, %v1425_v46 }
  0x95   :  { %v669_v48 = vpop.permute.xlu1 %668  ;;  %v164_v49 = vpop.permute.xlu0 %163 }
  0x96   :  { %vm705_vm11 = vcmp.eq.s32.totalorder %v669_v48, %v2082_v20  ;;  %vm200_vm12 = vcmp.eq.s32.totalorder %v164_v49, %v2082_v20 }
  0x97   :  { %v1426_v50 = vsel %vm705_vm11, 1.0, %v1829_v25  ;;  %v1358_v51 = vsel %vm200_vm12, 1.0, %v1829_v25 }
  0x98   :  { %1604 = vmatmul.mubr.msk.f32.gmra.mrb[4].mxu1 %vm248_vm0, %v1358_v51  ;;  %1668 = vmatmul.mubr.msk.f32.gmra.mrb[4].mxu0 %vm248_vm0, %v1426_v50 }
  0x99   :  { %v672_v52 = vpop.permute.xlu1 %671  ;;  %v167_v53 = vpop.permute.xlu0 %166 }
  0x9a   :  { %vm706_vm13 = vcmp.eq.s32.totalorder %v672_v52, %v2082_v20  ;;  %vm201_vm14 = vcmp.eq.s32.totalorder %v167_v53, %v2082_v20 }
  0x9b   :  { %v1427_v54 = vsel %vm706_vm13, 1.0, %v1829_v25  ;;  %v1359_v55 = vsel %vm201_vm14, 1.0, %v1829_v25 }
  0x9c   :  { %1606 = vmatprep.mubr.msk.f32.mxu1 %vm248_vm0, %v1359_v55  ;;  %1670 = vmatprep.mubr.msk.f32.mxu0 %vm248_vm0, %v1427_v54 }
  0x9d   :  { %v675_v56 = vpop.permute.xlu1 %674  ;;  %v170_v57 = vpop.permute.xlu0 %169 }
  0x9e   :  { %vm707_vm15 = vcmp.eq.s32.totalorder %v675_v56, %v2082_v20  ;;  %vm202_vm1 = vcmp.eq.s32.totalorder %v170_v57, %v2082_v20 }
  0x9f   :  { %v1428_v58 = vsel %vm707_vm15, 1.0, %v1829_v25  ;;  %v1360_v59 = vsel %vm202_vm1, 1.0, %v1829_v25 }
  0xa0   :  { %1607 = vmatmul.mubr.msk.f32.gmra.mrb[6].mxu1 %vm248_vm0, %v1360_v59  ;;  %1671 = vmatmul.mubr.msk.f32.gmra.mrb[6].mxu0 %vm248_vm0, %v1428_v58 }
  0xa1   :  { %v678_v60 = vpop.permute.xlu1 %677  ;;  %v173_v61 = vpop.permute.xlu0 %172 }
  0xa2   :  { %vm708_vm2 = vcmp.eq.s32.totalorder %v678_v60, %v2082_v20  ;;  %vm203_vm3 = vcmp.eq.s32.totalorder %v173_v61, %v2082_v20 }
  0xa3   :  { %v1429_v62 = vsel %vm708_vm2, 1.0, %v1829_v25  ;;  %v1361_v63 = vsel %vm203_vm3, 1.0, %v1829_v25 }
  0xa4   :  { %1609 = vmatprep.mubr.msk.f32.mxu1 %vm248_vm0, %v1361_v63  ;;  %1673 = vmatprep.mubr.msk.f32.mxu0 %vm248_vm0, %v1429_v62 }
  0xa5   :  { %v681_v0 = vpop.permute.xlu1 %680  ;;  %v176_v1 = vpop.permute.xlu0 %175 }
  0xa6   :  { %vm709_vm4 = vcmp.eq.s32.totalorder %v681_v0, %v2082_v20  ;;  %vm204_vm5 = vcmp.eq.s32.totalorder %v176_v1, %v2082_v20 }
  0xa7   :  { %v1430_v2 = vsel %vm709_vm4, 1.0, %v1829_v25  ;;  %v1362_v3 = vsel %vm204_vm5, 1.0, %v1829_v25 }
  0xa8   :  { %1610 = vmatmul.mubr.msk.f32.gmra.mrb[8].mxu1 %vm248_vm0, %v1362_v3  ;;  %1674 = vmatmul.mubr.msk.f32.gmra.mrb[8].mxu0 %vm248_vm0, %v1430_v2 }
  0xa9   :  { %v684_v4 = vpop.permute.xlu1 %683  ;;  %v179_v5 = vpop.permute.xlu0 %178 }
  0xaa   :  { %vm710_vm6 = vcmp.eq.s32.totalorder %v684_v4, %v2082_v20  ;;  %vm205_vm7 = vcmp.eq.s32.totalorder %v179_v5, %v2082_v20 }
  0xab   :  { %v1431_v6 = vsel %vm710_vm6, 1.0, %v1829_v25  ;;  %v1363_v7 = vsel %vm205_vm7, 1.0, %v1829_v25 }
  0xac   :  { %1612 = vmatprep.mubr.msk.f32.mxu1 %vm248_vm0, %v1363_v7  ;;  %1676 = vmatprep.mubr.msk.f32.mxu0 %vm248_vm0, %v1431_v6 }
  0xad   :  { %v687_v8 = vpop.permute.xlu1 %686  ;;  %v182_v9 = vpop.permute.xlu0 %181 }
  0xae   :  { %vm711_vm8 = vcmp.eq.s32.totalorder %v687_v8, %v2082_v20  ;;  %vm206_vm9 = vcmp.eq.s32.totalorder %v182_v9, %v2082_v20 }
  0xaf   :  { %v1432_v10 = vsel %vm711_vm8, 1.0, %v1829_v25  ;;  %v1364_v11 = vsel %vm206_vm9, 1.0, %v1829_v25 }
  0xb0   :  { %1613 = vmatmul.mubr.msk.f32.gmra.mrb[10].mxu1 %vm248_vm0, %v1364_v11  ;;  %1677 = vmatmul.mubr.msk.f32.gmra.mrb[10].mxu0 %vm248_vm0, %v1432_v10 }
  0xb1   :  { %v690_v12 = vpop.permute.xlu1 %689  ;;  %v185_v13 = vpop.permute.xlu0 %184 }
  0xb2   :  { %vm712_vm10 = vcmp.eq.s32.totalorder %v690_v12, %v2082_v20  ;;  %vm207_vm11 = vcmp.eq.s32.totalorder %v185_v13, %v2082_v20 }
  0xb3   :  { %v1433_v14 = vsel %vm712_vm10, 1.0, %v1829_v25  ;;  %v1365_v15 = vsel %vm207_vm11, 1.0, %v1829_v25 }
  0xb4   :  { %1615 = vmatprep.mubr.msk.f32.mxu1 %vm248_vm0, %v1365_v15  ;;  %1679 = vmatprep.mubr.msk.f32.mxu0 %vm248_vm0, %v1433_v14 }
  0xb5   :  { %v693_v16 = vpop.permute.xlu1 %692  ;;  %v188_v17 = vpop.permute.xlu0 %187 }
  0xb6   :  { %vm713_vm12 = vcmp.eq.s32.totalorder %v693_v16, %v2082_v20  ;;  %vm208_vm13 = vcmp.eq.s32.totalorder %v188_v17, %v2082_v20 }
  0xb7   :  { %v1434_v18 = vsel %vm713_vm12, 1.0, %v1829_v25  ;;  %v1366_v19 = vsel %vm208_vm13, 1.0, %v1829_v25 }
  0xb8   :  { %1616 = vmatmul.mubr.msk.f32.gmra.mrb[12].mxu1 %vm248_vm0, %v1366_v19  ;;  %1680 = vmatmul.mubr.msk.f32.gmra.mrb[12].mxu0 %vm248_vm0, %v1434_v18 }
  0xb9   :  { %v696_v21 = vpop.permute.xlu1 %695  ;;  %v191_v22 = vpop.permute.xlu0 %190 }
  0xba   :  { %vm714_vm14 = vcmp.eq.s32.totalorder %v696_v21, %v2082_v20  ;;  %vm209_vm15 = vcmp.eq.s32.totalorder %v191_v22, %v2082_v20 }
  0xbb   :  { %v1435_v23 = vsel %vm714_vm14, 1.0, %v1829_v25  ;;  %v1367_v24 = vsel %vm209_vm15, 1.0, %v1829_v25 }
  0xbc   :  { %1618 = vmatprep.mubr.msk.f32.mxu1 %vm248_vm0, %v1367_v24  ;;  %1682 = vmatprep.mubr.msk.f32.mxu0 %vm248_vm0, %v1435_v23 }
  0xbd   :  { %v699_v26 = vpop.permute.xlu1 %698  ;;  %v194_v27 = vpop.permute.xlu0 %193 }
  0xbe   :  { %vm715_vm1 = vcmp.eq.s32.totalorder %v699_v26, %v2082_v20  ;;  %vm210_vm2 = vcmp.eq.s32.totalorder %v194_v27, %v2082_v20 }
  0xbf   :  { %v1436_v28 = vsel %vm715_vm1, 1.0, %v1829_v25  ;;  %v1368_v29 = vsel %vm210_vm2, 1.0, %v1829_v25 }
  0xc0   :  { %1619 = vmatmul.mubr.msk.f32.gmra.mrb[14].mxu1 %vm248_vm0, %v1368_v29  ;;  %1683 = vmatmul.mubr.msk.f32.gmra.mrb[14].mxu0 %vm248_vm0, %v1436_v28 }
  0xc1   :  { %v981_v30 = vpop.permute.xlu1 %980  ;;  %v32_v31 = vpop.permute.xlu0 %31 }
  0xc2   :  { %vm1027_vm3 = vcmp.eq.s32.totalorder %v981_v30, %v2082_v20  ;;  %vm78_vm4 = vcmp.eq.s32.totalorder %v32_v31, %v2082_v20 }
  0xc3   :  { %v1473_v32 = vsel %vm1027_vm3, 1.0, %v1829_v25  ;;  %v1321_v33 = vsel %vm78_vm4, 1.0, %v1829_v25 }
  0xc4   :  { %1629 = vmatprep.mubr.msk.f32.mxu1 %vm248_vm0, %v1321_v33  ;;  %1693 = vmatprep.mubr.msk.f32.mxu0 %vm248_vm0, %v1473_v32 }
  0xc5   :  { %v984_v34 = vpop.permute.xlu1 %983  ;;  %v35_v35 = vpop.permute.xlu0 %34 }
  0xc6   :  { %vm1028_vm5 = vcmp.eq.s32.totalorder %v984_v34, %v2082_v20  ;;  %vm79_vm6 = vcmp.eq.s32.totalorder %v35_v35, %v2082_v20 }
  0xc7   :  { %v1474_v36 = vsel %vm1028_vm5, 1.0, %v1829_v25  ;;  %v1322_v37 = vsel %vm79_vm6, 1.0, %v1829_v25 }
  0xc8   :  { %1630 = vmatmul.mubr.msk.f32.vlgmr.msra.gmra.mrb[0].mxu1 %vm248_vm0, %v1322_v37  ;;  %1694 = vmatmul.mubr.msk.f32.vlgmr.msra.gmra.mrb[0].mxu0 %vm248_vm0, %v1474_v36 }
  0xc9   :  { %v987_v38 = vpop.permute.xlu1 %986  ;;  %v38_v39 = vpop.permute.xlu0 %37 }
  0xca   :  { %vm1029_vm7 = vcmp.eq.s32.totalorder %v987_v38, %v2082_v20  ;;  %vm80_vm8 = vcmp.eq.s32.totalorder %v38_v39, %v2082_v20 }
  0xcb   :  { %v1475_v40 = vsel %vm1029_vm7, 1.0, %v1829_v25  ;;  %v1323_v41 = vsel %vm80_vm8, 1.0, %v1829_v25 }
  0xcc   :  { %1632 = vmatprep.mubr.msk.f32.mxu1 %vm248_vm0, %v1323_v41  ;;  %1696 = vmatprep.mubr.msk.f32.mxu0 %vm248_vm0, %v1475_v40 }
  0xcd   :  { %v990_v42 = vpop.permute.xlu1 %989  ;;  %v41_v43 = vpop.permute.xlu0 %40 }
  0xce   :  { %vm1030_vm9 = vcmp.eq.s32.totalorder %v990_v42, %v2082_v20  ;;  %vm81_vm10 = vcmp.eq.s32.totalorder %v41_v43, %v2082_v20 }
  0xcf   :  { %v1476_v44 = vsel %vm1030_vm9, 1.0, %v1829_v25  ;;  %v1324_v45 = vsel %vm81_vm10, 1.0, %v1829_v25 }
  0xd0   :  { %1633 = vmatmul.mubr.msk.f32.gmra.mrb[2].mxu1 %vm248_vm0, %v1324_v45  ;;  %1697 = vmatmul.mubr.msk.f32.gmra.mrb[2].mxu0 %vm248_vm0, %v1476_v44 }
  0xd1   :  { %v993_v46 = vpop.permute.xlu1 %992  ;;  %v44_v47 = vpop.permute.xlu0 %43 }
  0xd2   :  { %vm1031_vm11 = vcmp.eq.s32.totalorder %v993_v46, %v2082_v20  ;;  %vm82_vm12 = vcmp.eq.s32.totalorder %v44_v47, %v2082_v20 }
  0xd3   :  { %v1477_v48 = vsel %vm1031_vm11, 1.0, %v1829_v25  ;;  %v1325_v49 = vsel %vm82_vm12, 1.0, %v1829_v25 }
  0xd4   :  { %1635 = vmatprep.mubr.msk.f32.mxu1 %vm248_vm0, %v1325_v49  ;;  %1699 = vmatprep.mubr.msk.f32.mxu0 %vm248_vm0, %v1477_v48 }
  0xd5   :  { %v996_v50 = vpop.permute.xlu1 %995  ;;  %v47_v51 = vpop.permute.xlu0 %46 }
  0xd6   :  { %vm1032_vm13 = vcmp.eq.s32.totalorder %v996_v50, %v2082_v20  ;;  %vm83_vm14 = vcmp.eq.s32.totalorder %v47_v51, %v2082_v20 }
  0xd7   :  { %v1478_v52 = vsel %vm1032_vm13, 1.0, %v1829_v25  ;;  %v1326_v53 = vsel %vm83_vm14, 1.0, %v1829_v25 }
  0xd8   :  { %1636 = vmatmul.mubr.msk.f32.gmra.mrb[4].mxu1 %vm248_vm0, %v1326_v53  ;;  %1700 = vmatmul.mubr.msk.f32.gmra.mrb[4].mxu0 %vm248_vm0, %v1478_v52 }
  0xd9   :  { %v999_v54 = vpop.permute.xlu1 %998  ;;  %v50_v55 = vpop.permute.xlu0 %49 }
  0xda   :  { %vm1033_vm15 = vcmp.eq.s32.totalorder %v999_v54, %v2082_v20  ;;  %vm84_vm1 = vcmp.eq.s32.totalorder %v50_v55, %v2082_v20 }
  0xdb   :  { %v1479_v56 = vsel %vm1033_vm15, 1.0, %v1829_v25  ;;  %v1327_v57 = vsel %vm84_vm1, 1.0, %v1829_v25 }
  0xdc   :  { %1638 = vmatprep.mubr.msk.f32.mxu1 %vm248_vm0, %v1327_v57  ;;  %1702 = vmatprep.mubr.msk.f32.mxu0 %vm248_vm0, %v1479_v56 }
  0xdd   :  { %v1002_v58 = vpop.permute.xlu1 %1001  ;;  %v53_v59 = vpop.permute.xlu0 %52 }
  0xde   :  { %vm1034_vm2 = vcmp.eq.s32.totalorder %v1002_v58, %v2082_v20  ;;  %vm85_vm3 = vcmp.eq.s32.totalorder %v53_v59, %v2082_v20 }
  0xdf   :  { %v1480_v60 = vsel %vm1034_vm2, 1.0, %v1829_v25  ;;  %v1328_v61 = vsel %vm85_vm3, 1.0, %v1829_v25 }
  0xe0   :  { %1639 = vmatmul.mubr.msk.f32.gmra.mrb[6].mxu1 %vm248_vm0, %v1328_v61  ;;  %1703 = vmatmul.mubr.msk.f32.gmra.mrb[6].mxu0 %vm248_vm0, %v1480_v60 }
  0xe1   :  { %v1005_v62 = vpop.permute.xlu1 %1004  ;;  %v56_v63 = vpop.permute.xlu0 %55 }
  0xe2   :  { %vm1035_vm4 = vcmp.eq.s32.totalorder %v1005_v62, %v2082_v20  ;;  %vm86_vm5 = vcmp.eq.s32.totalorder %v56_v63, %v2082_v20 }
  0xe3   :  { %v1481_v0 = vsel %vm1035_vm4, 1.0, %v1829_v25  ;;  %v1329_v1 = vsel %vm86_vm5, 1.0, %v1829_v25 }
  0xe4   :  { %1641 = vmatprep.mubr.msk.f32.mxu1 %vm248_vm0, %v1329_v1  ;;  %1705 = vmatprep.mubr.msk.f32.mxu0 %vm248_vm0, %v1481_v0 }
  0xe5   :  { %v1008_v2 = vpop.permute.xlu1 %1007  ;;  %v59_v3 = vpop.permute.xlu0 %58 }
  0xe6   :  { %vm1036_vm6 = vcmp.eq.s32.totalorder %v1008_v2, %v2082_v20  ;;  %vm87_vm7 = vcmp.eq.s32.totalorder %v59_v3, %v2082_v20 }
  0xe7   :  { %v1482_v4 = vsel %vm1036_vm6, 1.0, %v1829_v25  ;;  %v1330_v5 = vsel %vm87_vm7, 1.0, %v1829_v25 }
  0xe8   :  { %1642 = vmatmul.mubr.msk.f32.gmra.mrb[8].mxu1 %vm248_vm0, %v1330_v5  ;;  %1706 = vmatmul.mubr.msk.f32.gmra.mrb[8].mxu0 %vm248_vm0, %v1482_v4 }
  0xe9   :  { %v1011_v6 = vpop.permute.xlu1 %1010  ;;  %v62_v7 = vpop.permute.xlu0 %61 }
  0xea   :  { %vm1037_vm8 = vcmp.eq.s32.totalorder %v1011_v6, %v2082_v20  ;;  %vm88_vm9 = vcmp.eq.s32.totalorder %v62_v7, %v2082_v20 }
  0xeb   :  { %v1483_v8 = vsel %vm1037_vm8, 1.0, %v1829_v25  ;;  %v1331_v9 = vsel %vm88_vm9, 1.0, %v1829_v25 }
  0xec   :  { %1644 = vmatprep.mubr.msk.f32.mxu1 %vm248_vm0, %v1331_v9  ;;  %1708 = vmatprep.mubr.msk.f32.mxu0 %vm248_vm0, %v1483_v8 }
  0xed   :  { %v1014_v10 = vpop.permute.xlu1 %1013  ;;  %v65_v11 = vpop.permute.xlu0 %64 }
  0xee   :  { %vm1038_vm10 = vcmp.eq.s32.totalorder %v1014_v10, %v2082_v20  ;;  %vm89_vm11 = vcmp.eq.s32.totalorder %v65_v11, %v2082_v20 }
  0xef   :  { %v1484_v12 = vsel %vm1038_vm10, 1.0, %v1829_v25  ;;  %v1332_v13 = vsel %vm89_vm11, 1.0, %v1829_v25 }
  0xf0   :  { %1645 = vmatmul.mubr.msk.f32.gmra.mrb[10].mxu1 %vm248_vm0, %v1332_v13  ;;  %1709 = vmatmul.mubr.msk.f32.gmra.mrb[10].mxu0 %vm248_vm0, %v1484_v12 }
  0xf1   :  { %v1017_v14 = vpop.permute.xlu1 %1016  ;;  %v68_v15 = vpop.permute.xlu0 %67 }
  0xf2   :  { %vm1039_vm12 = vcmp.eq.s32.totalorder %v1017_v14, %v2082_v20  ;;  %vm90_vm13 = vcmp.eq.s32.totalorder %v68_v15, %v2082_v20 }
  0xf3   :  { %v1485_v16 = vsel %vm1039_vm12, 1.0, %v1829_v25  ;;  %v1333_v17 = vsel %vm90_vm13, 1.0, %v1829_v25 }
  0xf4   :  { %1647 = vmatprep.mubr.msk.f32.mxu1 %vm248_vm0, %v1333_v17  ;;  %1711 = vmatprep.mubr.msk.f32.mxu0 %vm248_vm0, %v1485_v16 }
  0xf5   :  { %v1020_v18 = vpop.permute.xlu1 %1019  ;;  %v71_v19 = vpop.permute.xlu0 %70 }
  0xf6   :  { %vm1040_vm14 = vcmp.eq.s32.totalorder %v1020_v18, %v2082_v20  ;;  %vm91_vm15 = vcmp.eq.s32.totalorder %v71_v19, %v2082_v20 }
  0xf7   :  { %v1486_v21 = vsel %vm1040_vm14, 1.0, %v1829_v25  ;;  %v1334_v22 = vsel %vm91_vm15, 1.0, %v1829_v25 }
  0xf8   :  { %1648 = vmatmul.mubr.msk.f32.gmra.mrb[12].mxu1 %vm248_vm0, %v1334_v22  ;;  %1712 = vmatmul.mubr.msk.f32.gmra.mrb[12].mxu0 %vm248_vm0, %v1486_v21 }
  0xf9   :  { %v1023_v23 = vpop.permute.xlu1 %1022  ;;  %v74_v24 = vpop.permute.xlu0 %73 }
  0xfa   :  { %vm1041_vm1 = vcmp.eq.s32.totalorder %v1023_v23, %v2082_v20  ;;  %vm92_vm2 = vcmp.eq.s32.totalorder %v74_v24, %v2082_v20 }
  0xfb   :  { %v1487_v26 = vsel %vm1041_vm1, 1.0, %v1829_v25  ;;  %v1335_v27 = vsel %vm92_vm2, 1.0, %v1829_v25 }
  0xfc   :  { %1650 = vmatprep.mubr.msk.f32.mxu1 %vm248_vm0, %v1335_v27  ;;  %1714 = vmatprep.mubr.msk.f32.mxu0 %vm248_vm0, %v1487_v26 }
  0xfd   :  { %v1026_v28 = vpop.permute.xlu1 %1025  ;;  %v77_v29 = vpop.permute.xlu0 %76 }
  0xfe   :  { %vm1042_vm3 = vcmp.eq.s32.totalorder %v1026_v28, %v2082_v20  ;;  %vm93_vm4 = vcmp.eq.s32.totalorder %v77_v29, %v2082_v20 }
  0xff   :  { %v1488_v30 = vsel %vm1042_vm3, 1.0, %v1829_v25  ;;  %v1336_v31 = vsel %vm93_vm4, 1.0, %v1829_v25 }
 0x100   :  { %1651 = vmatmul.mubr.msk.f32.gmra.mrb[14].mxu1 %vm248_vm0, %v1336_v31  ;;  %1715 = vmatmul.mubr.msk.f32.gmra.mrb[14].mxu0 %vm248_vm0, %v1488_v30 }
 0x19b   :  { %v1631_v32 = vpop.f32.mrb[0].mxu1  ;;  %v1695_v33 = vpop.f32.mrb[0].mxu0 }
 0x19c   :  { %v1749_v34 = vadd.f32 %v1695_v33, %v1631_v32  ;;  %v556_v35 = vpop.f32.mrb[1].mxu1  ;;  %v1194_v36 = vpop.f32.mrb[1].mxu0 }
 0x19d   :  { %v1750_v37 = vadd.f32 %v1194_v36, %v556_v35 }
 0x19e   :  { %1290 = vst [vmem:[#allocation2 + $0x8] sm:$0xff] %v1749_v34 }
 0x19f   :  { %1289 = vst [vmem:[#allocation2] sm:$0xff] %v1750_v37 }
 0x1a3   :  { %v1634_v38 = vpop.f32.mrb[2].mxu1  ;;  %v1698_v39 = vpop.f32.mrb[2].mxu0 }
 0x1a4   :  { %v1751_v40 = vadd.f32 %v1698_v39, %v1634_v38  ;;  %v566_v20 = vpop.f32.mrb[3].mxu1  ;;  %v1204_v41 = vpop.f32.mrb[3].mxu0 }
 0x1a5   :  { %v1752_v42 = vadd.f32 %v1204_v41, %v566_v20 }
 0x1a6   :  { %1292 = vst [vmem:[#allocation2 + $0x18] sm:$0xff] %v1751_v40 }
 0x1a7   :  { %1291 = vst [vmem:[#allocation2 + $0x10] sm:$0xff] %v1752_v42 }
 0x1ab   :  { %v1637_v25 = vpop.f32.mrb[4].mxu1  ;;  %v1701_v43 = vpop.f32.mrb[4].mxu0 }
 0x1ac   :  { %v1753_v44 = vadd.f32 %v1701_v43, %v1637_v25  ;;  %v576_v45 = vpop.f32.mrb[5].mxu1  ;;  %v1214_v46 = vpop.f32.mrb[5].mxu0 }
 0x1ad   :  { %v1754_v47 = vadd.f32 %v1214_v46, %v576_v45 }
 0x1ae   :  { %1294 = vst [vmem:[#allocation2 + $0x28] sm:$0xff] %v1753_v44 }
 0x1af   :  { %1293 = vst [vmem:[#allocation2 + $0x20] sm:$0xff] %v1754_v47 }
 0x1b3   :  { %v1640_v48 = vpop.f32.mrb[6].mxu1  ;;  %v1704_v49 = vpop.f32.mrb[6].mxu0 }
 0x1b4   :  { %v1755_v50 = vadd.f32 %v1704_v49, %v1640_v48  ;;  %v586_v51 = vpop.f32.mrb[7].mxu1  ;;  %v1224_v52 = vpop.f32.mrb[7].mxu0 }
 0x1b5   :  { %v1756_v53 = vadd.f32 %v1224_v52, %v586_v51 }
 0x1b6   :  { %1296 = vst [vmem:[#allocation2 + $0x38] sm:$0xff] %v1755_v50 }
 0x1b7   :  { %1295 = vst [vmem:[#allocation2 + $0x30] sm:$0xff] %v1756_v53 }
 0x1bb   :  { %v1643_v54 = vpop.f32.mrb[8].mxu1  ;;  %v1707_v55 = vpop.f32.mrb[8].mxu0 }
 0x1bc   :  { %v1757_v56 = vadd.f32 %v1707_v55, %v1643_v54  ;;  %v596_v57 = vpop.f32.mrb[9].mxu1  ;;  %v1234_v58 = vpop.f32.mrb[9].mxu0 }
 0x1bd   :  { %v1758_v59 = vadd.f32 %v1234_v58, %v596_v57 }
 0x1be   :  { %1298 = vst [vmem:[#allocation2 + $0x48] sm:$0xff] %v1757_v56 }
 0x1bf   :  { %1297 = vst [vmem:[#allocation2 + $0x40] sm:$0xff] %v1758_v59 }
 0x1c3   :  { %v1646_v60 = vpop.f32.mrb[10].mxu1  ;;  %v1710_v61 = vpop.f32.mrb[10].mxu0 }
 0x1c4   :  { %v1759_v62 = vadd.f32 %v1710_v61, %v1646_v60  ;;  %v606_v63 = vpop.f32.mrb[11].mxu1  ;;  %v1244_v0 = vpop.f32.mrb[11].mxu0 }
 0x1c5   :  { %v1760_v1 = vadd.f32 %v1244_v0, %v606_v63 }
 0x1c6   :  { %1300 = vst [vmem:[#allocation2 + $0x58] sm:$0xff] %v1759_v62 }
 0x1c7   :  { %1299 = vst [vmem:[#allocation2 + $0x50] sm:$0xff] %v1760_v1 }
 0x1cb   :  { %v1649_v2 = vpop.f32.mrb[12].mxu1  ;;  %v1713_v3 = vpop.f32.mrb[12].mxu0 }
 0x1cc   :  { %v1761_v4 = vadd.f32 %v1713_v3, %v1649_v2  ;;  %v616_v5 = vpop.f32.mrb[13].mxu1  ;;  %v1254_v6 = vpop.f32.mrb[13].mxu0 }
 0x1cd   :  { %v1762_v7 = vadd.f32 %v1254_v6, %v616_v5 }
 0x1ce   :  { %1302 = vst [vmem:[#allocation2 + $0x68] sm:$0xff] %v1761_v4 }
 0x1cf   :  { %1301 = vst [vmem:[#allocation2 + $0x60] sm:$0xff] %v1762_v7 }
 0x1d3   :  { %v1652_v8 = vpop.f32.mrb[14].mxu1  ;;  %v1716_v9 = vpop.f32.mrb[14].mxu0 }
 0x1d4   :  { %v1763_v10 = vadd.f32 %v1716_v9, %v1652_v8  ;;  %v626_v11 = vpop.f32.mrb[15].mxu1  ;;  %v1264_v12 = vpop.f32.mrb[15].mxu0 }
 0x1d5   :  { %v1764_v13 = vadd.f32 %v1264_v12, %v626_v11 }
 0x1d6   :  { %1304 = vst [vmem:[#allocation2 + $0x78] sm:$0xff] %v1763_v10 }
 0x1d7   :  { %1303 = vst [vmem:[#allocation2 + $0x70] sm:$0xff] %v1764_v13 }
 0x1d8   :  { %1815 = shalt.err (!%p1812_p4)
}
 0x1d9   :  { %s1816_s4 = scalar_lea.hbm %s2304_s2, 2048 }
 0x1da   :  { %p1817_p5 = scmp.ne.s32.totalorder %s2304_s2, %s1816_s4  ;;  %p1820_p6 = scmp.lt.u32.totalorder %s1816_s4, %s2304_s2 }
 0x1dc   :  { %p1822_p7 = pnand %p1820_p6, %p1817_p5 }
 0x1de   :  { %1825 = shalt.err (!%p1822_p7)
}
 0x1df   :  { %s1831_s9 = smov 128   ;;  %s1832_s10 = smov 8  }
 0x1e0   :  { %1316 = dma.vmem_to_hbm [thread:$0]  %s1311_s28, 2048, %s2304_s2, [#allocation3], %s1831_s9, %s1831_s9, %s1832_s10  }
 0x1e1   :  { %1826 = dma.done.wait [#allocation3], 2048  }
 0x1e2   :  { %1827 = vsyncadd [#allocation3], 4294965248 }
 0x1e3   :  { %1320 = vsyncpa [#allocation3], 1 }

</bundles_post_ra>
